<compile_context>
chip_gen: v7x
topology: tpu7x:2x2x1
jax: 0.10.0
libtpu: 0.0.40
codegen_flags: <defaults>
</compile_context>

<pallas_src>
import functools
import math

import jax
import jax.numpy as jnp
from jax.experimental import pallas as pl
from jax.experimental.pallas import tpu as pltpu


def _round_up(n, m):
    return ((n + m - 1) // m) * m


def _pad_to(a, shape):
    pads = [(0, s - d) for d, s in zip(a.shape, shape)]
    return jnp.pad(a, pads)


def twoup_kernel(x_ref, w1_ref, b1_ref, w2_ref, b2_ref, out_ref):
    # matmul (MXU, f32 acc) -> bias + ReLU (f32 VPU) -> matmul -> bias.
    x = x_ref[...]
    h = jnp.dot(x, w1_ref[...], preferred_element_type=jnp.float32)
    h = jnp.maximum(h + b1_ref[...], 0.0)          # f32 bias add + ReLU
    h = h.astype(w2_ref.dtype)                     # bf16 only on dot operands
    out = jnp.dot(h, w2_ref[...], preferred_element_type=jnp.float32)
    out = out + b2_ref[...]
    out_ref[...] = out.astype(out_ref.dtype)


@functools.partial(jax.jit, static_argnames=("use_bf16", "tb"))
def twoup_forward(x, w1, b1, w2, b2, *, use_bf16=True, tb=512):
    """x: (B, C, H, W) float32. w1: (784, 64), b1: (64,), w2: (64, P), b2: (P,).

    Returns (B, P) float32 generated-parameter vectors.
    """
    B = x.shape[0]
    x2d = x.reshape(B, -1)                         # matches torch .view(B, -1)
    in_dim, hid = w1.shape
    out_dim = w2.shape[1]

    # Lane-dense padding: 784 -> 896, 64 -> 128, 136 -> 256.
    in_p = _round_up(in_dim, 128)
    hid_p = _round_up(hid, 128)
    out_p = _round_up(out_dim, 128)
    # Batch tile: at least 8 sublanes, up to `tb` rows per grid step.
    tb = min(tb, _round_up(B, 8))
    b_p = _round_up(B, tb)

    compute_dtype = jnp.bfloat16 if use_bf16 else x2d.dtype

    # Zero padding is semantics-preserving: padded K rows/cols contribute 0,
    # padded hidden cols give ReLU(0)=0 and hit zero W2 rows, padded output
    # cols and batch rows are sliced off below.
    x_pd = _pad_to(x2d, (b_p, in_p)).astype(compute_dtype)
    w1_pd = _pad_to(w1, (in_p, hid_p)).astype(compute_dtype)
    w2_pd = _pad_to(w2, (hid_p, out_p)).astype(compute_dtype)
    b1_pd = _pad_to(b1.reshape(1, hid), (1, hid_p)).astype(jnp.float32)
    b2_pd = _pad_to(b2.reshape(1, out_dim), (1, out_p)).astype(jnp.float32)

    out_full = pl.pallas_call(
        twoup_kernel,
        out_shape=jax.ShapeDtypeStruct((b_p, out_p), jnp.float32),
        grid=(b_p // tb,),
        in_specs=[
            pl.BlockSpec((tb, in_p), lambda i: (i, 0)),     # x tile per step
            pl.BlockSpec((in_p, hid_p), lambda i: (0, 0)),  # W1 resident
            pl.BlockSpec((1, hid_p), lambda i: (0, 0)),     # b1 resident
            pl.BlockSpec((hid_p, out_p), lambda i: (0, 0)), # W2 resident
            pl.BlockSpec((1, out_p), lambda i: (0, 0)),     # b2 resident
        ],
        out_specs=pl.BlockSpec((tb, out_p), lambda i: (i, 0)),
        compiler_params=pltpu.CompilerParams(
            dimension_semantics=("parallel",),              # v7x: 2 TCs
        ),
    )(x_pd, w1_pd, b1_pd, w2_pd, b2_pd)

    return out_full[:B, :out_dim]


def _linear_init(key, fan_in, fan_out, dtype=jnp.float32):
    """Deterministic PyTorch-style Linear init: U(-1/sqrt(fan_in), 1/sqrt(fan_in))."""
    kw, kb = jax.random.split(key)
    bound = 1.0 / math.sqrt(fan_in)
    w = jax.random.uniform(kw, (fan_in, fan_out), dtype, -bound, bound)
    b = jax.random.uniform(kb, (fan_out,), dtype, -bound, bound)
    return w, b


def _reference(x, w1, b1, w2, b2, *, use_bf16):
    """Pure-JAX reference with the same dtype policy as the kernel."""
    x2d = x.reshape(x.shape[0], -1)
    cd = jnp.bfloat16 if use_bf16 else x2d.dtype
    h = jnp.dot(x2d.astype(cd), w1.astype(cd),
                preferred_element_type=jnp.float32)
    h = jnp.maximum(h + b1.astype(jnp.float32), 0.0).astype(cd)
    out = jnp.dot(h, w2.astype(cd), preferred_element_type=jnp.float32)
    return out + b2.astype(jnp.float32)


if __name__ == "__main__":
    key = jax.random.PRNGKey(0)
    k_x, k_l1, k_l2 = jax.random.split(key, 3)

    # Synthetic target network: nn.Linear(16, 8) -> 136 params to generate.
    target_in, target_out = 16, 8
    total_params_target = target_in * target_out + target_out  # 136

    # weight_generator = Linear(784, 64) -> ReLU -> Linear(64, 136)
    IN_DIM, HIDDEN = 784, 64
    w1, b1 = _linear_init(k_l1, IN_DIM, HIDDEN)
    w2, b2 = _linear_init(k_l2, HIDDEN, total_params_target)

    # MNIST-like NCHW input: (B=2, C=1, 28, 28) -> flattens to 784.
    x = jax.random.normal(k_x, (2, 1, 28, 28), jnp.float32)

    # --- bf16-matmul path (default; v6e/v7x fast path) ---
    out_bf16 = jax.block_until_ready(twoup_forward(x, w1, b1, w2, b2))
    ref_bf16 = _reference(x, w1, b1, w2, b2, use_bf16=True)
    assert out_bf16.shape == (2, total_params_target)
    assert jnp.allclose(out_bf16, ref_bf16, atol=1e-4, rtol=1e-4)

    # Loose check of the bf16 path against the exact f32 math.
    ref_f32 = _reference(x, w1, b1, w2, b2, use_bf16=False)
    assert jnp.allclose(out_bf16, ref_f32, atol=5e-2, rtol=5e-2)

    # --- f32 path (same kernel, no cast) checked tightly against f32 math ---
    out_f32 = jax.block_until_ready(
        twoup_forward(x, w1, b1, w2, b2, use_bf16=False))
    assert jnp.allclose(out_f32, ref_f32, atol=1e-4, rtol=1e-4)

    # TODO(synk): HyperNet.propagate (torch.func.functional_call re-binding the
    # generated vector into the target network) is host-side glue, not a kernel.

    print("KERNEL_OK")
</pallas_src>

<mosaic_0001>
module attributes {stable_mosaic.version = 11 : i64} {
  func.func @twoup_kernel(%arg0: i32, %arg1: memref<8x896xbf16, #tpu.memory_space<vmem>>, %arg2: memref<896x128xbf16, #tpu.memory_space<vmem>>, %arg3: memref<1x128xf32, #tpu.memory_space<vmem>>, %arg4: memref<128x256xbf16, #tpu.memory_space<vmem>>, %arg5: memref<1x256xf32, #tpu.memory_space<vmem>>, %arg6: memref<8x256xf32, #tpu.memory_space<vmem>>) attributes {dimension_semantics = [#tpu.dimension_semantics<parallel>], iteration_bounds = array<i64: 1>, scalar_prefetch = 0 : i64, scratch_operands = 0 : i64, tpu.core_type = #tpu.core_type<tc>, window_params = [{transform_indices = @transform_0, window_bounds = array<i64: 8, 896>}, {pipeline_mode = #tpu.pipeline_mode<synchronous>, transform_indices = @transform_1, window_bounds = array<i64: 896, 128>}, {pipeline_mode = #tpu.pipeline_mode<synchronous>, transform_indices = @transform_2, window_bounds = array<i64: 1, 128>}, {pipeline_mode = #tpu.pipeline_mode<synchronous>, transform_indices = @transform_3, window_bounds = array<i64: 128, 256>}, {pipeline_mode = #tpu.pipeline_mode<synchronous>, transform_indices = @transform_4, window_bounds = array<i64: 1, 256>}, {transform_indices = @transform_5, window_bounds = array<i64: 8, 256>}]} {
    %c0 = arith.constant 0 : index
    %c0_0 = arith.constant 0 : index
    %0 = vector.load %arg1[%c0, %c0_0] : memref<8x896xbf16, #tpu.memory_space<vmem>>, vector<8x896xbf16>
    %c0_1 = arith.constant 0 : index
    %c0_2 = arith.constant 0 : index
    %1 = vector.load %arg2[%c0_1, %c0_2] : memref<896x128xbf16, #tpu.memory_space<vmem>>, vector<896x128xbf16>
    %cst = arith.constant dense<0.000000e+00> : vector<8x128xf32>
    %2 = tpu.matmul %0, %1, %cst {dimension_numbers = #tpu.dot_dimension_numbers<[1], [0], [0], [1], [0, 0, 1, 1], [], []>} : vector<8x896xbf16>, vector<896x128xbf16>, vector<8x128xf32> -> vector<8x128xf32>
    %c0_3 = arith.constant 0 : index
    %c0_4 = arith.constant 0 : index
    %3 = vector.load %arg3[%c0_3, %c0_4] : memref<1x128xf32, #tpu.memory_space<vmem>>, vector<1x128xf32>
    %4 = vector.broadcast %3 : vector<1x128xf32> to vector<8x128xf32>
    %5 = arith.addf %2, %4 : vector<8x128xf32>
    %cst_5 = arith.constant 0.000000e+00 : f32
    %6 = vector.broadcast %cst_5 : f32 to vector<8x128xf32>
    %7 = arith.maximumf %5, %6 : vector<8x128xf32>
    %8 = arith.truncf %7 : vector<8x128xf32> to vector<8x128xbf16>
    %c0_6 = arith.constant 0 : index
    %c0_7 = arith.constant 0 : index
    %9 = vector.load %arg4[%c0_6, %c0_7] : memref<128x256xbf16, #tpu.memory_space<vmem>>, vector<128x256xbf16>
    %cst_8 = arith.constant dense<0.000000e+00> : vector<8x256xf32>
    %10 = tpu.matmul %8, %9, %cst_8 {dimension_numbers = #tpu.dot_dimension_numbers<[1], [0], [0], [1], [0, 0, 1, 1], [], []>} : vector<8x128xbf16>, vector<128x256xbf16>, vector<8x256xf32> -> vector<8x256xf32>
    %c0_9 = arith.constant 0 : index
    %c0_10 = arith.constant 0 : index
    %11 = vector.load %arg5[%c0_9, %c0_10] : memref<1x256xf32, #tpu.memory_space<vmem>>, vector<1x256xf32>
    %12 = vector.broadcast %11 : vector<1x256xf32> to vector<8x256xf32>
    %13 = arith.addf %10, %12 : vector<8x256xf32>
    %c0_11 = arith.constant 0 : index
    %c0_12 = arith.constant 0 : index
    %14 = vector.load %arg6[%c0_11, %c0_12] : memref<8x256xf32, #tpu.memory_space<vmem>>, vector<8x256xf32>
    tpu.vector_store %arg6[%c0_11, %c0_12], %13 {strides = array<i32>} : memref<8x256xf32, #tpu.memory_space<vmem>>, vector<8x256xf32>,
    return
  }
  func.func @transform_0(%arg0: i32) -> (i32, i32) {
    %c0_i32 = arith.constant 0 : i32
    %c0_i32_0 = arith.constant 0 : i32
    return %arg0, %c0_i32 : i32, i32
  }
  func.func @transform_1(%arg0: i32) -> (i32, i32) {
    %c0_i32 = arith.constant 0 : i32
    %c0_i32_0 = arith.constant 0 : i32
    %c0_i32_1 = arith.constant 0 : i32
    return %c0_i32, %c0_i32_0 : i32, i32
  }
  func.func @transform_2(%arg0: i32) -> (i32, i32) {
    %c0_i32 = arith.constant 0 : i32
    %c0_i32_0 = arith.constant 0 : i32
    %c0_i32_1 = arith.constant 0 : i32
    return %c0_i32, %c0_i32_0 : i32, i32
  }
  func.func @transform_3(%arg0: i32) -> (i32, i32) {
    %c0_i32 = arith.constant 0 : i32
    %c0_i32_0 = arith.constant 0 : i32
    %c0_i32_1 = arith.constant 0 : i32
    return %c0_i32, %c0_i32_0 : i32, i32
  }
  func.func @transform_4(%arg0: i32) -> (i32, i32) {
    %c0_i32 = arith.constant 0 : i32
    %c0_i32_0 = arith.constant 0 : i32
    %c0_i32_1 = arith.constant 0 : i32
    return %c0_i32, %c0_i32_0 : i32, i32
  }
  func.func @transform_5(%arg0: i32) -> (i32, i32) {
    %c0_i32 = arith.constant 0 : i32
    %c0_i32_0 = arith.constant 0 : i32
    return %arg0, %c0_i32 : i32, i32
  }
}

</mosaic_0001>

<bundles_post_ra>
// kernel: twoup_forward.1
= control target key start
LH: loop header
LB: loop body
LE: loop exit
PB: predicated region body
PF: predicated region fallthrough
CT: control target
= control target key end

     0   :  { %v1087_v42 = vmov 0.0   ;;  %vm1088_vm0 = vmmov 0   ;;  %s1360_s1 = inlined_call_operand.vmem [shape: bf16[896,128], index: 1, kind: input, shape index: {}]   ;;  %s1361_s0 = inlined_call_operand.vmem [shape: bf16[8,896], index: 0, kind: input, shape index: {}]   ;;  %s1362_s3 = inlined_call_operand.vmem [shape: bf16[128,256], index: 3, kind: input, shape index: {}]   ;;  %s1363_s2 = inlined_call_operand.vmem [shape: f32[1,128], index: 2, kind: input, shape index: {}]   ;;  %s1364_s4 = inlined_call_operand.vmem [shape: f32[1,256], index: 4, kind: input, shape index: {}]   ;;  %s1365_s5 = inlined_call_operand.vmem [shape: f32[8,256], index: 5, kind: output, shape index: {}]  }
   0x1   :  { %v1000_v0 = vld [vmem:[%s1360_s1 + $0x40] sm:$0xff]   ;;  %v1004_v4 = vld [vmem:[%s1360_s1 + $0x48] sm:$0xff]   ;;  %v1008_v8 = vld [vmem:[%s1360_s1 + $0x50] sm:$0xff]  }
   0x2   :  { %v1001_v1 = vld [vmem:[%s1360_s1] sm:$0xff]   ;;  %902 = vmatprep.subr.bf16.mxu0 %v1000_v0  ;;  %v1005_v5 = vld [vmem:[%s1360_s1 + $0x8] sm:$0xff]   ;;  %v1009_v9 = vld [vmem:[%s1360_s1 + $0x10] sm:$0xff]  }
   0x3   :  { %v1002_v2 = vld [vmem:[%s1360_s1 + $0xc0] sm:$0xff]   ;;  %903 = vmatpush3.bf16.msra.mxu0 %v1001_v1  ;;  %v1006_v6 = vld [vmem:[%s1360_s1 + $0xc8] sm:$0xff]   ;;  %v1010_v10 = vld [vmem:[%s1360_s1 + $0xd0] sm:$0xff]  }
   0x4   :  { %v1003_v3 = vld [vmem:[%s1360_s1 + $0x80] sm:$0xff]   ;;  %924 = vmatprep.subr.bf16.mxu1 %v1002_v2  ;;  %904 = vmatprep.subr.bf16.mxu0 %v1004_v4  ;;  %v1007_v7 = vld [vmem:[%s1360_s1 + $0x88] sm:$0xff]   ;;  %v1011_v11 = vld [vmem:[%s1360_s1 + $0x90] sm:$0xff]  }
   0x5   :  { %925 = vmatpush3.bf16.msra.mxu1 %v1003_v3  ;;  %v1012_v12 = vld [vmem:[%s1360_s1 + $0x58] sm:$0xff]   ;;  %v1016_v16 = vld [vmem:[%s1360_s1 + $0x60] sm:$0xff]   ;;  %v1020_v20 = vld [vmem:[%s1360_s1 + $0x68] sm:$0xff]  }
   0x6   :  { %926 = vmatprep.subr.bf16.mxu1 %v1006_v6  ;;  %v1013_v13 = vld [vmem:[%s1360_s1 + $0x18] sm:$0xff]   ;;  %v1017_v17 = vld [vmem:[%s1360_s1 + $0x20] sm:$0xff]   ;;  %v1021_v21 = vld [vmem:[%s1360_s1 + $0x28] sm:$0xff]  }
   0x7   :  { %905 = vmatpush3.bf16.msra.mxu0 %v1005_v5  ;;  %v1014_v14 = vld [vmem:[%s1360_s1 + $0xd8] sm:$0xff]   ;;  %v1018_v18 = vld [vmem:[%s1360_s1 + $0xe0] sm:$0xff]   ;;  %v1022_v22 = vld [vmem:[%s1360_s1 + $0xe8] sm:$0xff]  }
   0x8   :  { %906 = vmatprep.subr.bf16.mxu0 %v1008_v8  ;;  %v1015_v15 = vld [vmem:[%s1360_s1 + $0x98] sm:$0xff]   ;;  %v1019_v19 = vld [vmem:[%s1360_s1 + $0xa0] sm:$0xff]   ;;  %v1023_v23 = vld [vmem:[%s1360_s1 + $0xa8] sm:$0xff]  }
   0x9   :  { %927 = vmatpush3.bf16.msra.mxu1 %v1007_v7  ;;  %v1024_v24 = vld [vmem:[%s1360_s1 + $0x70] sm:$0xff]   ;;  %v1028_v28 = vld [vmem:[%s1360_s1 + $0x78] sm:$0xff]   ;;  %v21_v31 = vld [vmem:[%s1361_s0] sm:$0xff] }
   0xa   :  { %928 = vmatprep.subr.bf16.mxu1 %v1010_v10  ;;  %v1025_v25 = vld [vmem:[%s1360_s1 + $0x30] sm:$0xff]   ;;  %v1029_v29 = vld [vmem:[%s1360_s1 + $0x38] sm:$0xff]   ;;  %v823_v32 = vcombine.low %v21_v31, %v21_v31  ;;  %v824_v33 = vcombine.high %v21_v31, %v21_v31  ;;  %v1034_v35 = vld [vmem:[%s1360_s1 + $0x140] sm:$0xff]  }
   0xb   :  { %907 = vmatpush3.bf16.msra.mxu0 %v1009_v9  ;;  %v1026_v26 = vld [vmem:[%s1360_s1 + $0xf0] sm:$0xff]   ;;  %v1030_v30 = vld [vmem:[%s1360_s1 + $0xf8] sm:$0xff]   ;;  %v22_v36 = vld [vmem:[%s1361_s0 + $0x8] sm:$0xff] }
   0xc   :  { %908 = vmatprep.subr.bf16.mxu0 %v1012_v12  ;;  %v1027_v27 = vld [vmem:[%s1360_s1 + $0xb0] sm:$0xff]   ;;  %v1033_v34 = vld [vmem:[%s1360_s1 + $0xb8] sm:$0xff]   ;;  %537 = vmatprep.mubr.bf16.mxu0 %v824_v33  ;;  %v825_v37 = vcombine.low %v22_v36, %v22_v36  ;;  %v826_v38 = vcombine.high %v22_v36, %v22_v36  ;;  %v1037_v39 = vld [vmem:[%s1360_s1 + $0x100] sm:$0xff]  }
   0xd   :  { %929 = vmatpush3.bf16.msra.mxu1 %v1011_v11  ;;  %v1038_v40 = vld [vmem:[%s1360_s1 + $0x180] sm:$0xff]   ;;  %v1039_v41 = vld [vmem:[%s1360_s1 + $0x148] sm:$0xff]   ;;  %v1042_v45 = vld [vmem:[%s1360_s1 + $0x150] sm:$0xff]  }
   0xe   :  { %930 = vmatprep.subr.bf16.mxu1 %v1014_v14  ;;  %577 = vmatprep.mubr.bf16.mxu1 %v826_v38  ;;  %v1040_v43 = vld [vmem:[%s1360_s1 + $0x108] sm:$0xff]   ;;  %v1043_v46 = vld [vmem:[%s1360_s1 + $0x110] sm:$0xff]   ;;  %v1045_v48 = vld [vmem:[%s1360_s1 + $0x158] sm:$0xff]  }
   0xf   :  { %909 = vmatpush3.bf16.msra.mxu0 %v1013_v13  ;;  %v1041_v44 = vld [vmem:[%s1360_s1 + $0x188] sm:$0xff]   ;;  %v1044_v47 = vld [vmem:[%s1360_s1 + $0x190] sm:$0xff]   ;;  %v1046_v49 = vld [vmem:[%s1360_s1 + $0x118] sm:$0xff]  }
  0x10   :  { %910 = vmatprep.subr.bf16.mxu0 %v1016_v16  ;;  %v1048_v50 = vld [vmem:[%s1360_s1 + $0x160] sm:$0xff]   ;;  %v1047_v51 = vld [vmem:[%s1360_s1 + $0x198] sm:$0xff]   ;;  %v1051_v53 = vld [vmem:[%s1360_s1 + $0x168] sm:$0xff]  }
  0x11   :  { %931 = vmatpush3.bf16.msra.mxu1 %v1015_v15  ;;  %v1049_v52 = vld [vmem:[%s1360_s1 + $0x120] sm:$0xff]   ;;  %v1052_v55 = vld [vmem:[%s1360_s1 + $0x128] sm:$0xff]   ;;  %v1054_v56 = vld [vmem:[%s1360_s1 + $0x170] sm:$0xff]  }
  0x12   :  { %932 = vmatprep.subr.bf16.mxu1 %v1018_v18  ;;  %v1050_v54 = vld [vmem:[%s1360_s1 + $0x1a0] sm:$0xff]   ;;  %v1053_v57 = vld [vmem:[%s1360_s1 + $0x1a8] sm:$0xff]   ;;  %v23_v58 = vld [vmem:[%s1361_s0 + $0x10] sm:$0xff] }
  0x13   :  { %911 = vmatpush3.bf16.msra.mxu0 %v1017_v17  ;;  %v1055_v59 = vld [vmem:[%s1360_s1 + $0x130] sm:$0xff]   ;;  %v828_v60 = vcombine.high %v23_v58, %v23_v58  ;;  %v1057_v61 = vld [vmem:[%s1360_s1 + $0x178] sm:$0xff]   ;;  %v827_v1 = vcombine.low %v23_v58, %v23_v58  ;;  %v1063_v3 = vld [vmem:[%s1362_s3] ss:$8 sps:$4 sm:$0xff]  }
  0x14   :  { %912 = vmatprep.subr.bf16.mxu0 %v1020_v20  ;;  %v1056_v62 = vld [vmem:[%s1360_s1 + $0x1b0] sm:$0xff]   ;;  %v1058_v63 = vld [vmem:[%s1360_s1 + $0x138] sm:$0xff]   ;;  %v1065_v4 = vld [vmem:[%s1362_s3 + $0x4] ss:$8 sps:$4 sm:$0xff]  }
  0x15   :  { %933 = vmatpush3.bf16.msra.mxu1 %v1019_v19  ;;  %v1061_v0 = vld [vmem:[%s1360_s1 + $0x1b8] sm:$0xff]   ;;  %v1071_v7 = vld [vmem:[%s1362_s3 + $0x24] ss:$8 sps:$4 sm:$0xff]   ;;  %v1069_v8 = vld [vmem:[%s1362_s3 + $0x20] ss:$8 sps:$4 sm:$0xff]   ;;  %v1089_v19 = vmov 0  }
  0x16   :  { %934 = vmatprep.subr.bf16.mxu1 %v1022_v22  ;;  %v1062_v2 = vld [vmem:[%s1361_s0 + $0x18] ss:$0 sps:$4 sm:$0xff]   ;;  %v1068_v5 = vld [vmem:[%s1362_s3 + $0x14] ss:$8 sps:$4 sm:$0xff]   ;;  %v1077_v11 = vld [vmem:[%s1362_s3 + $0x44] ss:$8 sps:$4 sm:$0xff]  }
  0x17   :  { %913 = vmatpush3.bf16.msra.mxu0 %v1021_v21  ;;  %v1066_v6 = vld [vmem:[%s1362_s3 + $0x10] ss:$8 sps:$4 sm:$0xff]   ;;  %v1074_v9 = vld [vmem:[%s1362_s3 + $0x34] ss:$8 sps:$4 sm:$0xff]   ;;  %v1075_v12 = vld [vmem:[%s1362_s3 + $0x40] ss:$8 sps:$4 sm:$0xff]  }
  0x18   :  { %914 = vmatprep.subr.bf16.mxu0 %v1024_v24  ;;  %v1072_v10 = vld [vmem:[%s1362_s3 + $0x30] ss:$8 sps:$4 sm:$0xff]   ;;  %v1080_v13 = vld [vmem:[%s1362_s3 + $0x54] ss:$8 sps:$4 sm:$0xff]   ;;  %v1083_v15 = vld [vmem:[%s1362_s3 + $0x64] ss:$8 sps:$4 sm:$0xff]  }
  0x19   :  { %935 = vmatpush3.bf16.msra.mxu1 %v1023_v23  ;;  %v1078_v14 = vld [vmem:[%s1362_s3 + $0x50] ss:$8 sps:$4 sm:$0xff]   ;;  %v1081_v16 = vld [vmem:[%s1362_s3 + $0x60] ss:$8 sps:$4 sm:$0xff]   ;;  %v1086_v17 = vld [vmem:[%s1362_s3 + $0x74] ss:$8 sps:$4 sm:$0xff]  }
  0x1a   :  { %936 = vmatprep.subr.bf16.mxu1 %v1026_v26  ;;  %v1084_v18 = vld [vmem:[%s1362_s3 + $0x70] ss:$8 sps:$4 sm:$0xff]   ;;  %v822_v21 = vld [vmem:[%s1363_s2] ss:$0 sm:$0xff] }
  0x1b   :  { %915 = vmatpush3.bf16.msra.mxu0 %v1025_v25 }
  0x1c   :  { %916 = vmatprep.subr.bf16.mxu0 %v1028_v28 }
  0x1d   :  { %937 = vmatpush3.bf16.msra.mxu1 %v1027_v27 }
  0x1e   :  { %938 = vmatprep.subr.bf16.mxu1 %v1030_v30 }
  0x1f   :  { %917 = vmatpush3.bf16.msra.mxu0 %v1029_v29 }
  0x20   :  { %946 = vmatprep.subr.bf16.mxu0 %v1034_v35 }
  0x21   :  { %939 = vmatpush3.bf16.msra.mxu1 %v1033_v34 }
  0x22   :  { %538 = vmatmul.mubr.bf16.vlgmr.msra.gmra.mrb[0].mxu0 %v823_v32  ;;  %977 = vmatprep.subr.bf16.mxu1 %v1087_v42 }
  0x23   :  { %947 = vmatpush3.bf16.msra.mxu0 %v1037_v39  ;;  %617 = vmatprep.mubr.bf16.mxu0 %v828_v60 }
  0x24   :  { %578 = vmatmul.mubr.bf16.vlgmr.msra.gmra.mrb[0].mxu1 %v825_v37  ;;  %948 = vmatprep.subr.bf16.mxu0 %v1039_v41 }
  0x25   :  { %978 = vmatpush3.bf16.msra.mxu1 %v1038_v40  ;;  %993 = vmatprep.mubr.msk.bf16.mxu1 %vm1088_vm0, %v1087_v42 }
  0x26   :  { %979 = vmatprep.subr.bf16.mxu1 %v1087_v42 }
  0x27   :  { %949 = vmatpush3.bf16.msra.mxu0 %v1040_v43 }
  0x28   :  { %950 = vmatprep.subr.bf16.mxu0 %v1042_v45 }
  0x29   :  { %980 = vmatpush3.bf16.msra.mxu1 %v1041_v44 }
  0x2a   :  { %981 = vmatprep.subr.bf16.mxu1 %v1087_v42 }
  0x2b   :  { %951 = vmatpush3.bf16.msra.mxu0 %v1043_v46  ;;  %v685_v46 = vlaneseq }
  0x2c   :  { %952 = vmatprep.subr.bf16.mxu0 %v1045_v48 }
  0x2d   :  { %982 = vmatpush3.bf16.msra.mxu1 %v1044_v47  ;;  %v686_v47 = vshrl.u32 %v685_v46, 7 }
  0x2e   :  { %983 = vmatprep.subr.bf16.mxu1 %v1087_v42 }
  0x2f   :  { %953 = vmatpush3.bf16.msra.mxu0 %v1046_v49  ;;  %v687_v48 = vsub.s32 0, %v686_v47  ;;  %v683_v49 = vld [vmem:[%s1364_s4] sm:$0x3] }
  0x30   :  { %954 = vmatprep.subr.bf16.mxu0 %v1048_v50  ;;  %v691_v50 = vsub.s32 1, %v686_v47 }
  0x31   :  { %984 = vmatpush3.bf16.msra.mxu1 %v1047_v51  ;;  %v688_v51 = vrot.slane %v683_v49, %v687_v48 }
  0x32   :  { %985 = vmatprep.subr.bf16.mxu1 %v1087_v42 }
  0x33   :  { %955 = vmatpush3.bf16.msra.mxu0 %v1049_v52  ;;  %v692_v52 = vrot.slane %v683_v49, %v691_v50 }
  0x34   :  { %956 = vmatprep.subr.bf16.mxu0 %v1051_v53 }
  0x35   :  { %986 = vmatpush3.bf16.msra.mxu1 %v1050_v54 }
  0x36   :  { %987 = vmatprep.subr.bf16.mxu1 %v1087_v42 }
  0x37   :  { %957 = vmatpush3.bf16.msra.mxu0 %v1052_v55 }
  0x38   :  { %958 = vmatprep.subr.bf16.mxu0 %v1054_v56 }
  0x39   :  { %988 = vmatpush3.bf16.msra.mxu1 %v1053_v57 }
  0x3a   :  { %989 = vmatprep.subr.bf16.mxu1 %v1087_v42 }
  0x3b   :  { %959 = vmatpush3.bf16.msra.mxu0 %v1055_v59 }
  0x3c   :  { %960 = vmatprep.subr.bf16.mxu0 %v1057_v61 }
  0x3d   :  { %990 = vmatpush3.bf16.msra.mxu1 %v1056_v62 }
  0x3e   :  { %991 = vmatprep.subr.bf16.mxu1 %v1087_v42 }
  0x3f   :  { %961 = vmatpush3.bf16.msra.mxu0 %v1058_v63 }
  0x40   :  { %775 = vmatprep.subr.bf16.mxu0 %v1065_v4 }
  0x41   :  { %992 = vmatpush3.bf16.msra.mxu1 %v1061_v0 }
  0x42   :  { %618 = vmatmul.mubr.bf16.vlgmr.msra.gmra.mrb[4].mxu0 %v827_v1 }
  0x43   :  { %776 = vmatpush1.bf16.msra.mxu0 %v1063_v3  ;;  %807 = vmatprep.mubr.bf16.mxu0 %v1089_v19 }
  0x44   :  { %994 = vmatmul.mubr.bf16.vlgmr.msra.gmra.mrb[4].mxu1 %v1062_v2  ;;  %777 = vmatprep.subr.bf16.mxu0 %v1068_v5 }
  0x47   :  { %778 = vmatpush1.bf16.msra.mxu0 %v1066_v6 }
  0x48   :  { %779 = vmatprep.subr.bf16.mxu0 %v1071_v7 }
  0x4b   :  { %780 = vmatpush1.bf16.msra.mxu0 %v1069_v8 }
  0x4c   :  { %781 = vmatprep.subr.bf16.mxu0 %v1074_v9 }
  0x4f   :  { %782 = vmatpush1.bf16.msra.mxu0 %v1072_v10 }
  0x50   :  { %783 = vmatprep.subr.bf16.mxu0 %v1077_v11 }
  0x53   :  { %784 = vmatpush1.bf16.msra.mxu0 %v1075_v12 }
  0x54   :  { %785 = vmatprep.subr.bf16.mxu0 %v1080_v13 }
  0x57   :  { %786 = vmatpush1.bf16.msra.mxu0 %v1078_v14 }
  0x58   :  { %787 = vmatprep.subr.bf16.mxu0 %v1083_v15 }
  0x5b   :  { %788 = vmatpush1.bf16.msra.mxu0 %v1081_v16 }
  0x5c   :  { %789 = vmatprep.subr.bf16.mxu0 %v1086_v17 }
  0x5f   :  { %790 = vmatpush1.bf16.msra.mxu0 %v1084_v18 }
  0xf5   :  { %v918_v20 = vpop.f32.mrb[0].mxu0 }
  0xf6   :  { %v919_v22 = vpop.f32.mrb[1].mxu0 }
  0xf7   :  { %v920_v23 = vadd.f32 %v919_v22, %v918_v20  ;;  %v921_v24 = vpop.f32.mrb[2].mxu0  ;;  %v940_v25 = vpop.f32.mrb[0].mxu1 }
  0xf8   :  { %v922_v26 = vpop.f32.mrb[3].mxu0  ;;  %v941_v27 = vpop.f32.mrb[1].mxu1 }
  0xf9   :  { %v540_v28 = vadd.f32 %v920_v23, %v822_v21  ;;  %v942_v29 = vadd.f32 %v941_v27, %v940_v25  ;;  %v943_v30 = vpop.f32.mrb[2].mxu1 }
  0xfa   :  { %v944_v31 = vpop.f32.mrb[3].mxu1 }
  0xfb   :  { %v580_v32 = vadd.f32 %v942_v29, %v540_v28 }
 0x115   :  { %v962_v33 = vpop.f32.mrb[4].mxu0 }
 0x116   :  { %v963_v34 = vpop.f32.mrb[5].mxu0 }
 0x117   :  { %v964_v35 = vadd.f32 %v963_v34, %v962_v33  ;;  %v965_v36 = vpop.f32.mrb[6].mxu0  ;;  %v659_v37 = vpop.f32.mrb[4].mxu1 }
 0x118   :  { %v966_v38 = vpop.f32.mrb[7].mxu0  ;;  %v995_v39 = vpop.f32.mrb[5].mxu1 }
 0x119   :  { %v620_v40 = vadd.f32 %v964_v35, %v580_v32  ;;  %v662_v41 = vpop.f32.mrb[6].mxu1 }
 0x11a   :  { %v996_v42 = vpop.f32.mrb[7].mxu1 }
 0x11b   :  { %v660_v43 = vadd.f32 %v659_v37, %v620_v40 }
 0x11d   :  { %v665_v44 = vmax.f32 %v660_v43, 0.0 }
 0x11f   :  { %v666_v45 = vpack.c.bf16 %v665_v44, %v665_v44 }
 0x121   :  { %808 = vmatmul.mubr.bf16.vlgmr.msra.gmra.mrb[8].mxu0 %v666_v45 }
 0x1f4   :  { %v809_v53 = vpop.f32.mrb[8].mxu0 }
 0x1f5   :  { %v810_v54 = vadd.f32 %v809_v53, %v688_v51  ;;  %v811_v55 = vpop.f32.mrb[9].mxu0 }
 0x1f6   :  { %v812_v56 = vadd.f32 %v811_v55, %v692_v52  ;;  %v813_v57 = vpop.f32.mrb[10].mxu0 }
 0x1f7   :  { %816 = vst [vmem:[%s1365_s5] sm:$0xff] %v810_v54  ;;  %v814_v58 = vpop.f32.mrb[11].mxu0 }
 0x1f8   :  { %817 = vst [vmem:[%s1365_s5 + $0x8] sm:$0xff] %v812_v56 }

</bundles_post_ra>
